<compile_context>
chip_gen: v6e
topology: v6e:2x2x1
jax: 0.10.0
libtpu: 0.0.40
codegen_flags: <defaults>
</compile_context>

<pallas_src>
import functools
import math

import jax
import jax.numpy as jnp
from jax.experimental import pallas as pl
from jax.experimental.pallas import tpu as pltpu

_LANE = 128


# ---------------------------------------------------------------------------
# Kernel 1: one-shot MLP on the (1, E) init embedding -> lane-dense (1, W) row.
# ---------------------------------------------------------------------------
def _mlp_row_kernel(x_ref, w1_ref, b1_ref, w2_ref, b2_ref, w3_ref, b3_ref,
                    out_ref, *, reps):
    h = jnp.dot(x_ref[...], w1_ref[...], preferred_element_type=jnp.float32) + b1_ref[...]
    h = jnp.maximum(h, 0.0)
    h = jnp.dot(h, w2_ref[...], preferred_element_type=jnp.float32) + b2_ref[...]
    h = jnp.maximum(h, 0.0)
    y = jnp.dot(h, w3_ref[...], preferred_element_type=jnp.float32) + b3_ref[...]
    # Lane-dense row: y repeated `reps` times along lanes (reps*E == W, W % 128 == 0).
    if reps == 1:
        out_ref[...] = y.astype(out_ref.dtype)
    else:
        out_ref[...] = jnp.tile(y, (1, reps)).astype(out_ref.dtype)


def mlp_lane_row(init_emb, w1, b1, w2, b2, w3, b3):
    """Compute y = MLP(init_emb) once; return it tiled to (1, W), W = lcm(E, 128)."""
    E = init_emb.shape[-1]
    W = (E * _LANE) // math.gcd(E, _LANE)
    reps = W // E
    x2d = init_emb.reshape(1, E).astype(jnp.float32)
    b1_2d, b2_2d, b3_2d = b1.reshape(1, E), b2.reshape(1, E), b3.reshape(1, E)

    # Every block equals the full array extent -> always a legal tiling.
    vec_spec = pl.BlockSpec((1, E), lambda i: (0, 0))
    mat_spec = pl.BlockSpec((E, E), lambda i: (0, 0))
    return pl.pallas_call(
        functools.partial(_mlp_row_kernel, reps=reps),
        out_shape=jax.ShapeDtypeStruct((1, W), jnp.float32),
        grid_spec=pltpu.PrefetchScalarGridSpec(
            num_scalar_prefetch=0,
            grid=(1,),
            in_specs=[vec_spec,                    # init_emb (1, E)
                      mat_spec, vec_spec,          # W1, b1
                      mat_spec, vec_spec,          # W2, b2
                      mat_spec, vec_spec],         # W3, b3
            out_specs=pl.BlockSpec((1, W), lambda i: (0, 0)),
        ),
    )(x2d, w1, b1_2d, w2, b2_2d, w3, b3_2d)


# ---------------------------------------------------------------------------
# Kernel 2: broadcast the resident (1, W) row across the output tile.
# Pure vector-store / HBM-writeback stream; no per-step recompute.
# ---------------------------------------------------------------------------
def _fill_kernel(row_ref, out_ref):
    out_ref[...] = jnp.broadcast_to(row_ref[...], out_ref.shape).astype(out_ref.dtype)


def broadcast_row(row_lane, num_nodes, emb_size, *, target_block_bytes=1 << 20):
    """Return the MLP row repeated to shape (num_nodes, emb_size)."""
    if num_nodes == 0:
        return jnp.zeros((0, emb_size), jnp.float32)
    W = row_lane.shape[-1]
    total = num_nodes * emb_size
    slab_rows = -(-total // W)  # ceil: lane-dense slab (slab_rows, W) holds >= total elems

    # Largest row tile with ~1 MiB output blocks (double-buffered: ~2 MiB VMEM,
    # comfortably under the scoped budget on v5e/v6e/v7x even with 64 MiB VMEM).
    max_rows = max(8, (target_block_bytes // (W * 4)) // 8 * 8)
    if slab_rows <= max_rows:
        tile_rows = slab_rows          # single full-extent block (always legal)
    else:
        tile_rows = max_rows           # multiple of 8; last partial block is masked
    grid = (pl.cdiv(slab_rows, tile_rows),)

    slab = pl.pallas_call(
        _fill_kernel,
        out_shape=jax.ShapeDtypeStruct((slab_rows, W), jnp.float32),
        grid_spec=pltpu.PrefetchScalarGridSpec(
            num_scalar_prefetch=0,
            grid=grid,
            in_specs=[pl.BlockSpec((1, W), lambda i: (0, 0))],      # resident row
            out_specs=pl.BlockSpec((tile_rows, W), lambda i: (i, 0)),
        ),
        compiler_params=pltpu.CompilerParams(
            dimension_semantics=("parallel",)),
    )(row_lane)

    # Exact wrapper-side reinterpretation: every flat element p of the slab equals
    # y[p % E], so trimming to num_nodes*E and reshaping preserves row semantics.
    flat = slab.reshape(-1)[:total]
    return flat.reshape(num_nodes, emb_size)


# ---------------------------------------------------------------------------
# Module wrapper + synthetic parameters.
# ---------------------------------------------------------------------------
def make_mlp_params(key, emb_size):
    """Deterministic synthetic parameters for MLP(emb, emb, emb, num_layer=3)."""
    ks = jax.random.split(key, 7)
    scale = 1.0 / jnp.sqrt(emb_size)
    w1 = jax.random.normal(ks[0], (emb_size, emb_size), jnp.float32) * scale
    b1 = jax.random.normal(ks[1], (emb_size,), jnp.float32) * scale
    w2 = jax.random.normal(ks[2], (emb_size, emb_size), jnp.float32) * scale
    b2 = jax.random.normal(ks[3], (emb_size,), jnp.float32) * scale
    w3 = jax.random.normal(ks[4], (emb_size, emb_size), jnp.float32) * scale
    b3 = jax.random.normal(ks[5], (emb_size,), jnp.float32) * scale
    init_emb = jax.random.normal(ks[6], (emb_size,), jnp.float32)  # torch.randn(emb)
    return dict(w1=w1, b1=b1, w2=w2, b2=b2, w3=w3, b3=b3, init_emb=init_emb)


def cnf_pre_stage(batch, params, graph_type="lcg"):
    """JAX/Pallas equivalent of CNFPreStage.forward for graph_type in {lcg, lig}."""
    assert graph_type in ("lcg", "lig")
    out = dict(batch)
    lp = params["l"]
    E = lp["init_emb"].shape[-1]

    # MLP computed exactly once per parameter set.
    l_row = mlp_lane_row(lp["init_emb"], lp["w1"], lp["b1"], lp["w2"], lp["b2"],
                         lp["w3"], lp["b3"])

    # pos_l and neg_l use the identical row: one fused fill, sliced afterwards.
    n_pos, n_neg = batch["num_pos_l"], batch["num_neg_l"]
    lit = broadcast_row(l_row, n_pos + n_neg, E)
    out["pos_l_emb"] = lit[:n_pos]
    out["neg_l_emb"] = lit[n_pos:]

    if graph_type == "lcg":
        cp = params["c"]
        c_row = mlp_lane_row(cp["init_emb"], cp["w1"], cp["b1"], cp["w2"], cp["b2"],
                             cp["w3"], cp["b3"])
        out["c_emb"] = broadcast_row(c_row, batch["num_c"], E)
    return out


def _mlp_ref(p):
    x = p["init_emb"][None, :]
    h = jnp.maximum(x @ p["w1"] + p["b1"][None, :], 0.0)
    h = jnp.maximum(h @ p["w2"] + p["b2"][None, :], 0.0)
    return h @ p["w3"] + p["b3"][None, :]


if __name__ == "__main__":
    emb_size = 32
    num_pos_l, num_neg_l, num_c = 8, 8, 16

    key = jax.random.PRNGKey(0)
    k_l, k_c = jax.random.split(key)
    params = {"l": make_mlp_params(k_l, emb_size),
              "c": make_mlp_params(k_c, emb_size)}

    l_ref = _mlp_ref(params["l"])
    c_ref = _mlp_ref(params["c"])

    # Small case (single-block fill path).
    batch = {"num_pos_l": num_pos_l, "num_neg_l": num_neg_l, "num_c": num_c}
    out = cnf_pre_stage(batch, params, graph_type="lcg")
    jax.block_until_ready(out["pos_l_emb"])
    jax.block_until_ready(out["neg_l_emb"])
    jax.block_until_ready(out["c_emb"])

    assert out["pos_l_emb"].shape == (num_pos_l, emb_size)
    assert out["neg_l_emb"].shape == (num_neg_l, emb_size)
    assert out["c_emb"].shape == (num_c, emb_size)
    assert jnp.allclose(out["pos_l_emb"],
                        jnp.broadcast_to(l_ref, (num_pos_l, emb_size)), atol=1e-5)
    assert jnp.allclose(out["neg_l_emb"],
                        jnp.broadcast_to(l_ref, (num_neg_l, emb_size)), atol=1e-5)
    assert jnp.allclose(out["c_emb"],
                        jnp.broadcast_to(c_ref, (num_c, emb_size)), atol=1e-5)

    # Larger case exercising the multi-block (tiled, masked-tail) fill path and
    # the non-multiple-of-W trim path (3000*32 % 128 != 0 is false; 5000*... is fine
    # either way — trim logic is exercised whenever total % W != 0).
    big = cnf_pre_stage({"num_pos_l": 5000, "num_neg_l": 5000, "num_c": 3000},
                        params, graph_type="lcg")
    jax.block_until_ready(big["pos_l_emb"])
    jax.block_until_ready(big["neg_l_emb"])
    jax.block_until_ready(big["c_emb"])
    assert big["pos_l_emb"].shape == (5000, emb_size)
    assert big["neg_l_emb"].shape == (5000, emb_size)
    assert big["c_emb"].shape == (3000, emb_size)
    assert jnp.allclose(big["pos_l_emb"],
                        jnp.broadcast_to(l_ref, (5000, emb_size)), atol=1e-5)
    assert jnp.allclose(big["neg_l_emb"],
                        jnp.broadcast_to(l_ref, (5000, emb_size)), atol=1e-5)
    assert jnp.allclose(big["c_emb"],
                        jnp.broadcast_to(c_ref, (3000, emb_size)), atol=1e-5)

    print("KERNEL_OK")
</pallas_src>

<mosaic_0001>
module attributes {stable_mosaic.version = 11 : i64} {
  func.func @_mlp_row_kernel(%arg0: i32, %arg1: memref<1x32xf32, #tpu.memory_space<vmem>>, %arg2: memref<32x32xf32, #tpu.memory_space<vmem>>, %arg3: memref<1x32xf32, #tpu.memory_space<vmem>>, %arg4: memref<32x32xf32, #tpu.memory_space<vmem>>, %arg5: memref<1x32xf32, #tpu.memory_space<vmem>>, %arg6: memref<32x32xf32, #tpu.memory_space<vmem>>, %arg7: memref<1x32xf32, #tpu.memory_space<vmem>>, %arg8: memref<1x128xf32, #tpu.memory_space<vmem>>) attributes {dimension_semantics = [#tpu.dimension_semantics<arbitrary>], iteration_bounds = array<i64: 1>, scalar_prefetch = 0 : i64, scratch_operands = 0 : i64, tpu.core_type = #tpu.core_type<tc>, window_params = [{pipeline_mode = #tpu.pipeline_mode<synchronous>, transform_indices = @transform_0, window_bounds = array<i64: 1, 32>}, {pipeline_mode = #tpu.pipeline_mode<synchronous>, transform_indices = @transform_1, window_bounds = array<i64: 32, 32>}, {pipeline_mode = #tpu.pipeline_mode<synchronous>, transform_indices = @transform_2, window_bounds = array<i64: 1, 32>}, {pipeline_mode = #tpu.pipeline_mode<synchronous>, transform_indices = @transform_3, window_bounds = array<i64: 32, 32>}, {pipeline_mode = #tpu.pipeline_mode<synchronous>, transform_indices = @transform_4, window_bounds = array<i64: 1, 32>}, {pipeline_mode = #tpu.pipeline_mode<synchronous>, transform_indices = @transform_5, window_bounds = array<i64: 32, 32>}, {pipeline_mode = #tpu.pipeline_mode<synchronous>, transform_indices = @transform_6, window_bounds = array<i64: 1, 32>}, {pipeline_mode = #tpu.pipeline_mode<synchronous>, transform_indices = @transform_7, window_bounds = array<i64: 1, 128>}]} {
    %c0 = arith.constant 0 : index
    %c0_0 = arith.constant 0 : index
    %0 = vector.load %arg1[%c0, %c0_0] : memref<1x32xf32, #tpu.memory_space<vmem>>, vector<1x32xf32>
    %c0_1 = arith.constant 0 : index
    %c0_2 = arith.constant 0 : index
    %1 = vector.load %arg2[%c0_1, %c0_2] : memref<32x32xf32, #tpu.memory_space<vmem>>, vector<32x32xf32>
    %cst = arith.constant dense<0.000000e+00> : vector<1x32xf32>
    %2 = tpu.matmul %0, %1, %cst {dimension_numbers = #tpu.dot_dimension_numbers<[1], [0], [0], [1], [0, 0, 1, 1], [], []>} : vector<1x32xf32>, vector<32x32xf32>, vector<1x32xf32> -> vector<1x32xf32>
    %c0_3 = arith.constant 0 : index
    %c0_4 = arith.constant 0 : index
    %3 = vector.load %arg3[%c0_3, %c0_4] : memref<1x32xf32, #tpu.memory_space<vmem>>, vector<1x32xf32>
    %4 = arith.addf %2, %3 : vector<1x32xf32>
    %cst_5 = arith.constant 0.000000e+00 : f32
    %5 = vector.broadcast %cst_5 : f32 to vector<1x32xf32>
    %6 = arith.maximumf %4, %5 : vector<1x32xf32>
    %c0_6 = arith.constant 0 : index
    %c0_7 = arith.constant 0 : index
    %7 = vector.load %arg4[%c0_6, %c0_7] : memref<32x32xf32, #tpu.memory_space<vmem>>, vector<32x32xf32>
    %cst_8 = arith.constant dense<0.000000e+00> : vector<1x32xf32>
    %8 = tpu.matmul %6, %7, %cst_8 {dimension_numbers = #tpu.dot_dimension_numbers<[1], [0], [0], [1], [0, 0, 1, 1], [], []>} : vector<1x32xf32>, vector<32x32xf32>, vector<1x32xf32> -> vector<1x32xf32>
    %c0_9 = arith.constant 0 : index
    %c0_10 = arith.constant 0 : index
    %9 = vector.load %arg5[%c0_9, %c0_10] : memref<1x32xf32, #tpu.memory_space<vmem>>, vector<1x32xf32>
    %10 = arith.addf %8, %9 : vector<1x32xf32>
    %cst_11 = arith.constant 0.000000e+00 : f32
    %11 = vector.broadcast %cst_11 : f32 to vector<1x32xf32>
    %12 = arith.maximumf %10, %11 : vector<1x32xf32>
    %c0_12 = arith.constant 0 : index
    %c0_13 = arith.constant 0 : index
    %13 = vector.load %arg6[%c0_12, %c0_13] : memref<32x32xf32, #tpu.memory_space<vmem>>, vector<32x32xf32>
    %cst_14 = arith.constant dense<0.000000e+00> : vector<1x32xf32>
    %14 = tpu.matmul %12, %13, %cst_14 {dimension_numbers = #tpu.dot_dimension_numbers<[1], [0], [0], [1], [0, 0, 1, 1], [], []>} : vector<1x32xf32>, vector<32x32xf32>, vector<1x32xf32> -> vector<1x32xf32>
    %c0_15 = arith.constant 0 : index
    %c0_16 = arith.constant 0 : index
    %15 = vector.load %arg7[%c0_15, %c0_16] : memref<1x32xf32, #tpu.memory_space<vmem>>, vector<1x32xf32>
    %16 = arith.addf %14, %15 : vector<1x32xf32>
    %17 = tpu.concatenate %16, %16, %16, %16 in 1 : vector<1x32xf32>, vector<1x32xf32>, vector<1x32xf32>, vector<1x32xf32> -> vector<1x128xf32>
    %c0_17 = arith.constant 0 : index
    %c0_18 = arith.constant 0 : index
    %18 = vector.load %arg8[%c0_17, %c0_18] : memref<1x128xf32, #tpu.memory_space<vmem>>, vector<1x128xf32>
    tpu.vector_store %arg8[%c0_17, %c0_18], %17 {strides = array<i32>} : memref<1x128xf32, #tpu.memory_space<vmem>>, vector<1x128xf32>,
    return
  }
  func.func @transform_0(%arg0: i32) -> (i32, i32) {
    %c0_i32 = arith.constant 0 : i32
    %c0_i32_0 = arith.constant 0 : i32
    %c0_i32_1 = arith.constant 0 : i32
    return %c0_i32, %c0_i32_0 : i32, i32
  }
  func.func @transform_1(%arg0: i32) -> (i32, i32) {
    %c0_i32 = arith.constant 0 : i32
    %c0_i32_0 = arith.constant 0 : i32
    %c0_i32_1 = arith.constant 0 : i32
    return %c0_i32, %c0_i32_0 : i32, i32
  }
  func.func @transform_2(%arg0: i32) -> (i32, i32) {
    %c0_i32 = arith.constant 0 : i32
    %c0_i32_0 = arith.constant 0 : i32
    %c0_i32_1 = arith.constant 0 : i32
    return %c0_i32, %c0_i32_0 : i32, i32
  }
  func.func @transform_3(%arg0: i32) -> (i32, i32) {
    %c0_i32 = arith.constant 0 : i32
    %c0_i32_0 = arith.constant 0 : i32
    %c0_i32_1 = arith.constant 0 : i32
    return %c0_i32, %c0_i32_0 : i32, i32
  }
  func.func @transform_4(%arg0: i32) -> (i32, i32) {
    %c0_i32 = arith.constant 0 : i32
    %c0_i32_0 = arith.constant 0 : i32
    %c0_i32_1 = arith.constant 0 : i32
    return %c0_i32, %c0_i32_0 : i32, i32
  }
  func.func @transform_5(%arg0: i32) -> (i32, i32) {
    %c0_i32 = arith.constant 0 : i32
    %c0_i32_0 = arith.constant 0 : i32
    %c0_i32_1 = arith.constant 0 : i32
    return %c0_i32, %c0_i32_0 : i32, i32
  }
  func.func @transform_6(%arg0: i32) -> (i32, i32) {
    %c0_i32 = arith.constant 0 : i32
    %c0_i32_0 = arith.constant 0 : i32
    %c0_i32_1 = arith.constant 0 : i32
    return %c0_i32, %c0_i32_0 : i32, i32
  }
  func.func @transform_7(%arg0: i32) -> (i32, i32) {
    %c0_i32 = arith.constant 0 : i32
    %c0_i32_0 = arith.constant 0 : i32
    %c0_i32_1 = arith.constant 0 : i32
    return %c0_i32, %c0_i32_0 : i32, i32
  }
}

</mosaic_0001>

<bundles_post_ra>
// kernel: tpu_custom_call.1
= control target key start
LH: loop header
LB: loop body
LE: loop exit
PB: predicated region body
PF: predicated region fallthrough
CT: control target
= control target key end

     0   :  { %12 = vsyncpa [#allocation3], 0  ;;  %s614_s0 = inlined_call_operand.hbm [shape: f32[1,32], index: 0, kind: input, shape index: {}]   ;;  %s615_s1 = inlined_call_operand.hbm [shape: f32[32,32], index: 1, kind: input, shape index: {}]   ;;  %s616_s2 = inlined_call_operand.vmem [shape: f32[1,32], index: 2, kind: input, shape index: {}]   ;;  %s617_s3 = inlined_call_operand.hbm [shape: f32[32,32], index: 3, kind: input, shape index: {}]   ;;  %s618_s4 = inlined_call_operand.vmem [shape: f32[1,32], index: 4, kind: input, shape index: {}]   ;;  %s619_s5 = inlined_call_operand.hbm [shape: f32[32,32], index: 5, kind: input, shape index: {}]   ;;  %s620_s6 = inlined_call_operand.vmem [shape: f32[1,32], index: 6, kind: input, shape index: {}]   ;;  %s621_s7 = inlined_call_operand.hbm [shape: f32[1,128], index: 7, kind: output, shape index: {}]  }
   0x1   :  { %13 = vsyncpa [#allocation6], 0 }
   0x2   :  { %14 = vsyncpa [#allocation9], 0 }
   0x3   :  { %15 = vsyncpa [#allocation4], 0  ;;  %s522_s24 = smov [#allocation5]  }
   0x4   :  { %s31_s25 = sshll.u32 %s522_s24, 4  ;;  %s32_s25 = int_to_ptr.vmem [resolvable:$true] %s31_s25 }
   0x5   :  { %s422_s26 = scalar_lea.vmem %s32_s25, 512  ;;  %p427_p1 = scmp.lt.s32.totalorder %s32_s25, %s32_s25 }
   0x6   :  { %p423_p0 = scmp.ne.s32.totalorder %s32_s25, %s422_s26  ;;  %p428_p2 = scmp.lt.s32.totalorder %s422_s26, %s422_s26 }
   0x8   :  { %p429_p3 = por %p428_p2, %p427_p1 }
   0xa   :  { %p430_p4 = pnand %p429_p3, %p423_p0 }
   0xc   :  { %433 = shalt.err (!%p430_p4)
}
   0xd   :  { %s523_s27 = smov 128   ;;  %s524_s28 = smov 8  }
   0xe   :  { %37 = dma.hbm_to_vmem [thread:$0]  %s615_s1, 512, %s32_s25, [#allocation6], %s523_s27, %s523_s27, %s524_s28  }
   0xf   :  { %s525_s8 = smov [#allocation2]   ;;  %s526_s10 = smov [#allocation7]  }
  0x10   :  { %s22_s9 = sshll.u32 %s525_s8, 4  ;;  %s45_s11 = sshll.u32 %s526_s10, 4  ;;  %s23_s9 = int_to_ptr.vmem [resolvable:$true] %s22_s9  ;;  %s46_s11 = int_to_ptr.vmem [resolvable:$true] %s45_s11 }
  0x11   :  { %s442_s12 = scalar_lea.vmem %s23_s9, 16  ;;  %s446_s13 = scalar_lea.vmem %s23_s9, 32 }
  0x12   :  { %p443_p5 = scmp.ne.s32.totalorder %s23_s9, %s442_s12  ;;  %p447_p6 = scmp.lt.s32.totalorder %s23_s9, %s23_s9 }
  0x13   :  { %p448_p7 = scmp.lt.s32.totalorder %s446_s13, %s442_s12 }
  0x15   :  { %p449_p8 = por %p448_p7, %p447_p6 }
  0x17   :  { %p450_p9 = pnand %p449_p8, %p443_p5 }
  0x19   :  { %453 = shalt.err (!%p450_p9)
}
  0x1a   :  { %25 = dma.hbm_to_vmem [thread:$0]  %s614_s0, 16, %s23_s9, [#allocation3]  }
  0x1b   :  { %s462_s16 = scalar_lea.vmem %s46_s11, 512  ;;  %p467_p11 = scmp.lt.s32.totalorder %s46_s11, %s46_s11 }
  0x1c   :  { %p463_p10 = scmp.ne.s32.totalorder %s46_s11, %s462_s16  ;;  %p468_p12 = scmp.lt.s32.totalorder %s462_s16, %s462_s16 }
  0x1e   :  { %p469_p13 = por %p468_p12, %p467_p11 }
  0x20   :  { %p470_p0 = pnand %p469_p13, %p463_p10 }
  0x22   :  { %473 = shalt.err (!%p470_p0)
}
  0x23   :  { %51 = dma.hbm_to_vmem [thread:$0]  %s617_s3, 512, %s46_s11, [#allocation6], %s523_s27, %s523_s27, %s524_s28  }
  0x24   :  { %s527_s18 = smov [#allocation8]  }
  0x25   :  { %s59_s19 = sshll.u32 %s527_s18, 4  ;;  %s60_s19 = int_to_ptr.vmem [resolvable:$true] %s59_s19 }
  0x26   :  { %s482_s20 = scalar_lea.vmem %s60_s19, 512  ;;  %p487_p2 = scmp.lt.s32.totalorder %s60_s19, %s60_s19 }
  0x27   :  { %p483_p1 = scmp.ne.s32.totalorder %s60_s19, %s482_s20  ;;  %p488_p3 = scmp.lt.s32.totalorder %s482_s20, %s482_s20 }
  0x29   :  { %p489_p4 = por %p488_p3, %p487_p2 }
  0x2b   :  { %p490_p5 = pnand %p489_p4, %p483_p1 }
  0x2d   :  { %493 = shalt.err (!%p490_p5)
}
  0x2e   :  { %65 = dma.hbm_to_vmem [thread:$0]  %s619_s5, 512, %s60_s19, [#allocation9], %s523_s27, %s523_s27, %s524_s28  }
  0x2f   :  { %514 = dma.done.wait [#allocation3], 16  }
  0x30   :  { %515 = vsyncadd [#allocation3], 4294967280 }
  0x31   :  { %516 = dma.done.wait [#allocation6], 1024  }
  0x32   :  { %517 = vsyncadd [#allocation6], 4294966272 }
  0x33   :  { %518 = dma.done.wait [#allocation9], 512  }
  0x34   :  { %519 = vsyncadd [#allocation9], 4294966784  ;;  %v528_v0 = vmov 0.0   ;;  %vm529_vm0 = vmmov 0   ;;  %v84_v1 = vld [vmem:[#allocation5 + $0x18] sm:$0xff]  ;;  %v83_v2 = vld [vmem:[#allocation5 + $0x10] sm:$0xff] }
  0x35   :  { %369 = vmatprep.subr.mxu0 %v528_v0  ;;  %377 = vmatprep.mubr.msk.f32.mxu0 %vm529_vm0, %v528_v0  ;;  %v164_v3 = vld [vmem:[#allocation7 + $0x18] sm:$0xff]  ;;  %v82_v4 = vld [vmem:[#allocation5 + $0x8] sm:$0xff]  ;;  %v81_v5 = vld [vmem:[#allocation5] sm:$0xff]  ;;  %vm86_vm1 = vcmask 261120   ;;  %s530_s25 = smov 96   ;;  %s531_s26 = smov 32  }
  0x36   :  { %380 = vmatprep.subr.mxu1 %v528_v0  ;;  %388 = vmatprep.mubr.msk.f32.mxu1 %vm529_vm0, %v528_v0  ;;  %v80_v6 = vld [vmem:[#allocation2] sm:$0x1]  ;;  %v163_v7 = vld [vmem:[#allocation7 + $0x10] sm:$0xff]  ;;  %v162_v8 = vld [vmem:[#allocation7 + $0x8] sm:$0xff]  ;;  %s532_s27 = smov 64   ;;  %vm329_vm2 = vcmask 523264  }
  0x37   :  { %370 = vmatpush3.msra.mxu0 %v84_v1  ;;  %381 = vmatpush3.msra.mxu1 %v164_v3  ;;  %v161_v9 = vld [vmem:[#allocation7] sm:$0xff]  ;;  %v243_v10 = vld [vmem:[#allocation8 + $0x18] sm:$0xff]  ;;  %v242_v16 = vld [vmem:[#allocation8 + $0x10] sm:$0xff]  ;;  %vm331_vm3 = vcmask 785408  }
  0x38   :  { %371 = vmatprep.subr.mxu0 %v528_v0  ;;  %382 = vmatprep.subr.mxu1 %v528_v0  ;;  %v85_v11 = vld [vmem:[%s616_s2] sm:$0x1]  ;;  %v241_v17 = vld [vmem:[#allocation8 + $0x8] sm:$0xff]  ;;  %v240_v18 = vld [vmem:[#allocation8] sm:$0xff] }
  0x39   :  { %372 = vmatpush3.msra.mxu0 %v83_v2  ;;  %383 = vmatpush3.msra.mxu1 %v163_v7  ;;  %v165_v19 = vld [vmem:[%s618_s4] sm:$0x1]  ;;  %s533_s4 = smov [#allocation10]  }
  0x3a   :  { %373 = vmatprep.subr.mxu0 %v528_v0  ;;  %384 = vmatprep.subr.mxu1 %v528_v0  ;;  %v244_v24 = vld [vmem:[%s620_s6] sm:$0x1]  ;;  %s340_s28 = sshll.u32 %s533_s4, 4  ;;  %s341_s28 = int_to_ptr.vmem [resolvable:$true] %s340_s28 }
  0x3b   :  { %374 = vmatpush3.msra.mxu0 %v82_v4  ;;  %385 = vmatpush3.msra.mxu1 %v162_v8  ;;  %s494_s6 = scalar_lea.vmem %s341_s28, 16  ;;  %s498_s29 = scalar_lea.vmem %s341_s28, 32 }
  0x3c   :  { %375 = vmatprep.subr.mxu0 %v528_v0  ;;  %386 = vmatprep.subr.mxu1 %v528_v0  ;;  %p495_p6 = scmp.ne.s32.totalorder %s341_s28, %s494_s6  ;;  %p499_p7 = scmp.lt.s32.totalorder %s341_s28, %s341_s28 }
  0x3d   :  { %376 = vmatpush3.msra.mxu0 %v81_v5  ;;  %387 = vmatpush3.msra.mxu1 %v161_v9  ;;  %p500_p8 = scmp.lt.s32.totalorder %s498_s29, %s494_s6 }
  0x3e   :  { %378 = vmatmul.mubr.msk.f32.vlgmr.msra.gmra.mxu0 %vm86_vm1, %v80_v6  ;;  %391 = vmatprep.subr.mxu0 %v528_v0 }
  0x3f   :  { %399 = vmatprep.mubr.msk.f32.mxu0 %vm529_vm0, %v528_v0  ;;  %392 = vmatpush3.msra.mxu0 %v243_v10  ;;  %p501_p9 = por %p500_p8, %p499_p7 }
  0x40   :  { %393 = vmatprep.subr.mxu0 %v528_v0 }
  0x41   :  { %394 = vmatpush3.msra.mxu0 %v242_v16  ;;  %p502_p10 = pnand %p501_p9, %p495_p6 }
  0x42   :  { %395 = vmatprep.subr.mxu0 %v528_v0 }
  0x43   :  { %396 = vmatpush3.msra.mxu0 %v241_v17 }
  0x44   :  { %397 = vmatprep.subr.mxu0 %v528_v0 }
  0x45   :  { %398 = vmatpush3.msra.mxu0 %v240_v18 }
  0xfe   :  { %v156_v12 = vpop.f32.mrf.mxu0 }
  0xff   :  { %v157_v13 = vadd.f32 %v156_v12, %v85_v11 }
 0x100   :  { %v379_v14 = vpop.f32.mrf.mxu0 }
 0x101   :  { %v160_v15 = vmax.f32 %v157_v13, 0.0 }
 0x103   :  { %389 = vmatmul.mubr.msk.f32.vlgmr.msra.gmra.mxu1 %vm86_vm1, %v160_v15 }
 0x1c3   :  { %v235_v20 = vpop.f32.mrf.mxu1 }
 0x1c4   :  { %v236_v21 = vadd.f32 %v235_v20, %v165_v19 }
 0x1c5   :  { %v390_v22 = vpop.f32.mrf.mxu1 }
 0x1c6   :  { %v239_v23 = vmax.f32 %v236_v21, 0.0 }
 0x1c8   :  { %400 = vmatmul.mubr.msk.f32.vlgmr.msra.gmra.mxu0 %vm86_vm1, %v239_v23 }
 0x288   :  { %v314_v25 = vpop.f32.mrf.mxu0 }
 0x289   :  { %v315_v26 = vadd.f32 %v314_v25, %v244_v24 }
 0x28a   :  { %v401_v27 = vpop.f32.mrf.mxu0 }
 0x28b   :  { %325 = vrot.lane.b32.xlu1 %v315_v26, %s530_s25  ;;  %319 = vrot.lane.b32.xlu0 %v315_v26, %s531_s26 }
 0x28f   :  { %322 = vrot.lane.b32.xlu0 %v315_v26, %s532_s27 }
 0x2fd   :  { %v320_v28 = vpop.permute.xlu0 %319  ;;  %v326_v31 = vpop.permute.xlu1 %325 }
 0x2fe   :  { %v328_v29 = vsel %vm86_vm1, %v315_v26, %v320_v28 }
 0x301   :  { %v323_v30 = vpop.permute.xlu0 %322 }
 0x302   :  { %v330_v32 = vsel %vm329_vm2, %v328_v29, %v323_v30 }
 0x303   :  { %v332_v33 = vsel %vm331_vm3, %v330_v32, %v326_v31 }
 0x304   :  { %333 = vst [vmem:[#allocation10] sm:$0x1] %v332_v33 }
 0x305   :  { %505 = shalt.err (!%p502_p10)
}
 0x306   :  { %343 = dma.vmem_to_hbm [thread:$0]  %s341_s28, 16, %s621_s7, [#allocation4]  }
 0x307   :  { %520 = dma.done.wait [#allocation4], 16  }
 0x308   :  { %521 = vsyncadd [#allocation4], 4294967280 }
 0x309   :  { %347 = vsyncpa [#allocation3], 1 }
 0x30a   :  { %348 = vsyncpa [#allocation6], 1 }
 0x30b   :  { %349 = vsyncpa [#allocation9], 1 }
 0x30c   :  { %350 = vsyncpa [#allocation4], 1 }

</bundles_post_ra>
